<compile_context>
chip_gen: v6e
topology: v6e:2x2x1
jax: 0.10.0
libtpu: 0.0.40
codegen_flags: <defaults>
</compile_context>

<pallas_src>
import jax
import jax.numpy as jnp
from jax.experimental import pallas as pl
from jax.experimental.pallas import tpu as pltpu


def _vmem_capacity_bytes():
    """Per-core VMEM capacity; conservative fallback if the query is unavailable."""
    try:
        return int(pltpu.get_tpu_info().vmem_capacity_bytes)
    except Exception:
        return 64 * 1024 * 1024  # v7x per-TensorCore size; safe on v5e/v6e too


def _round_up(x, m):
    return ((x + m - 1) // m) * m


# ---------------------------------------------------------------------------
# Path 1: R < 128  — single fused kernel, lane-dense output (B, 3*R*R).
# ---------------------------------------------------------------------------
def fused_fold_kernel(secret_ref, wf_ref, bf_ref, out_ref):
    # secret: (TB, S), wf: (S, 3R^2), bf: (1, 3R^2), out: (TB, 3R^2)
    y = jnp.dot(secret_ref[...], wf_ref[...],
                preferred_element_type=jnp.float32) + bf_ref[...]
    out_ref[...] = jnp.maximum(y, 0.0)


def fused_dense_upsample_kernel(secret_ref, wt_ref, bias_ref, m_ref, out_ref):
    # Fallback for large S: secret (TB,S), wt (S,768), bias (1,768),
    # m (256, R^2) Kronecker replication, out (TB, 3R^2).
    y = jnp.dot(secret_ref[...], wt_ref[...],
                preferred_element_type=jnp.float32) + bias_ref[...]      # (TB, 768)
    r2 = m_ref.shape[1]
    for c in range(3):                                # static unroll over channels
        o_c = jnp.dot(y[:, c * 256:(c + 1) * 256], m_ref[...],
                      preferred_element_type=jnp.float32)                # (TB, R^2)
        out_ref[:, c * r2:(c + 1) * r2] = jnp.maximum(o_c, 0.0)


def _secret2image_small(secret, wt, bias2d, R):
    B, S = secret.shape
    s = R // 16
    r2 = R * R
    cap = _vmem_capacity_bytes()
    budget = int(0.70 * cap)
    fold = 3 * S <= 256   # fused weight (S,3R^2) smaller than the (256,R^2) rep matrix

    # Resident operands are double-buffered by the default pipeline -> count 2x.
    if fold:
        resident = 2 * (S + 1) * 3 * r2 * 4
    else:
        resident = 2 * (S * 768 + 768 + 256 * r2) * 4
    per_row = 2 * (3 * r2 + S) * 4                    # double-buffered out + in per row
    tb_cap = max(8, ((budget - resident) // per_row) // 8 * 8)
    TB = int(min(_round_up(B, 8), tb_cap, 128))       # review: big MXU M-dim batch tile
    Bp = _round_up(B, TB)
    if Bp != B:
        secret = jnp.pad(secret, ((0, Bp - B), (0, 0)))

    need = resident + TB * per_row + (2 << 20)
    params = pltpu.CompilerParams(
        dimension_semantics=("parallel",),
        vmem_limit_bytes=int(min(0.85 * cap, max(need, 32 << 20))),
    )

    if fold:
        # Exact fold of the upsample into the Linear: pure column gather of W^T/bias.
        HW = jnp.arange(r2)
        col16 = (HW // R // s) * 16 + (HW % R) // s                        # (R^2,)
        cols = (jnp.arange(3)[:, None] * 256 + col16[None, :]).reshape(-1)  # (3R^2,)
        w_fused = jnp.take(wt, cols, axis=1)                               # (S, 3R^2)
        b_fused = jnp.take(bias2d, cols, axis=1)                           # (1, 3R^2)

        out_flat = pl.pallas_call(
            fused_fold_kernel,
            out_shape=jax.ShapeDtypeStruct((Bp, 3 * r2), jnp.float32),
            grid=(Bp // TB,),
            in_specs=[
                pl.BlockSpec((TB, S), lambda i: (i, 0)),
                pl.BlockSpec((S, 3 * r2), lambda i: (0, 0)),   # resident
                pl.BlockSpec((1, 3 * r2), lambda i: (0, 0)),   # resident
            ],
            out_specs=pl.BlockSpec((TB, 3 * r2), lambda i: (i, 0)),
            compiler_params=params,
        )(secret, w_fused, b_fused)
    else:
        # Kronecker replication matrix M[h*16+w, H*R+W] = 1 iff H//s==h and W//s==w.
        hw = jnp.arange(256)
        h, w = hw // 16, hw % 16
        HW = jnp.arange(r2)
        H, W = HW // R, HW % R
        m = ((H[None, :] // s == h[:, None]) &
             (W[None, :] // s == w[:, None])).astype(jnp.float32)          # (256, R^2)

        out_flat = pl.pallas_call(
            fused_dense_upsample_kernel,
            out_shape=jax.ShapeDtypeStruct((Bp, 3 * r2), jnp.float32),
            grid=(Bp // TB,),
            in_specs=[
                pl.BlockSpec((TB, S), lambda i: (i, 0)),
                pl.BlockSpec((S, 768), lambda i: (0, 0)),      # resident
                pl.BlockSpec((1, 768), lambda i: (0, 0)),      # resident
                pl.BlockSpec((256, r2), lambda i: (0, 0)),     # resident
            ],
            out_specs=pl.BlockSpec((TB, 3 * r2), lambda i: (i, 0)),
            compiler_params=params,
        )(secret, wt, bias2d, m)

    # (Bp, 3R^2) is row-major identical to (Bp, 3, R, R): the reshape is free.
    return out_flat[:B].reshape(B, 3, R, R)


# ---------------------------------------------------------------------------
# Path 2: R >= 128  — XLA dense GEMM + one H-tiled upsample/ReLU kernel.
# ---------------------------------------------------------------------------
def upsample_relu_kernel(x_ref, repw_ref, reph_ref, out_ref, z_scr):
    # x: (TB, 48, 16) rows = c*16 + h of the dense output
    # repw: (16, R) column replication (0/1); reph: (TH, 48) row-replication tile (0/1)
    # out: (TB, TH, R); z_scr: (TB, 48, R) lane-dense intermediate, reused across row tiles
    tb = out_ref.shape[0]

    @pl.when(pl.program_id(1) == 0)
    def _():
        for t in range(tb):                           # static unroll over the batch tile
            z_scr[t] = jnp.dot(x_ref[t], repw_ref[...],
                               preferred_element_type=jnp.float32)   # (48, R) lane-dense

    for t in range(tb):
        rows = jnp.dot(reph_ref[...], z_scr[t],
                       preferred_element_type=jnp.float32)           # (TH, R)
        out_ref[t] = jnp.maximum(rows, 0.0)


def _secret2image_large(secret, wt, bias2d, R):
    B, S = secret.shape
    s = R // 16
    cap = _vmem_capacity_bytes()

    # Dense layer as a single plain-XLA GEMM (removes the extra pallas_call launch;
    # the (B,768) intermediate is negligible next to the (B,3,R,R) store stream).
    y = jnp.dot(secret, wt, preferred_element_type=jnp.float32) + bias2d   # (B, 768)
    x48 = y.reshape(B, 48, 16)                        # row = c*16 + h, col = w

    # Tile sizes: TB images and TH output rows (of 3R) per grid step.  The
    # double-buffered output block plus the z scratch is budgeted at ~45% of VMEM
    # so very large R degrades to row tiling instead of TB=1 / compile failure.
    comb_budget = int(0.45 * cap)
    TB = 8
    while TB > 1 and (2 * TB * 8 * R * 4 + TB * 48 * R * 4) > comb_budget:
        TB //= 2
    th_budget = comb_budget - TB * 48 * R * 4
    th_cap = min(3 * R, max(8, th_budget // (2 * TB * R * 4)))
    TH = 8
    for cand in range((th_cap // 8) * 8, 7, -8):      # largest mult-of-8 divisor of 3R
        if (3 * R) % cand == 0:
            TH = cand
            break

    Bp = _round_up(B, TB)
    if Bp != B:
        x48 = jnp.pad(x48, ((0, Bp - B), (0, 0), (0, 0)))

    # Exact 0/1 replication matrices.  repw: (16, R); reph: (3R, 48) with
    # reph[c*R + H, k] = 1 iff k == c*16 + H//s.
    repw = (jnp.arange(R)[None, :] // s ==
            jnp.arange(16)[:, None]).astype(jnp.float32)
    rows = jnp.arange(3 * R)
    src = (rows // R) * 16 + (rows % R) // s
    reph = (jnp.arange(48)[None, :] == src[:, None]).astype(jnp.float32)

    need = (2 * TB * TH * R * 4 + TB * 48 * R * 4 + 2 * TB * 48 * 16 * 4
            + 2 * 16 * R * 4 + 2 * TH * 48 * 4 + (2 << 20))
    vmem_limit = int(min(0.85 * cap, max(need, 32 << 20)))

    out_big = pl.pallas_call(
        upsample_relu_kernel,
        out_shape=jax.ShapeDtypeStruct((Bp, 3 * R, R), jnp.float32),
        grid=(Bp // TB, (3 * R) // TH),
        in_specs=[
            pl.BlockSpec((TB, 48, 16), lambda i, j: (i, 0, 0)),
            pl.BlockSpec((16, R), lambda i, j: (0, 0)),        # resident
            pl.BlockSpec((TH, 48), lambda i, j: (j, 0)),       # row-replication tile
        ],
        out_specs=pl.BlockSpec((TB, TH, R), lambda i, j: (i, j, 0)),
        scratch_shapes=[pltpu.VMEM((TB, 48, R), jnp.float32)],
        compiler_params=pltpu.CompilerParams(
            dimension_semantics=("parallel", "arbitrary"),
            vmem_limit_bytes=vmem_limit,
        ),
    )(x48, repw, reph)

    # (Bp, 3R, R) rows are ordered channel-major then H: reshape to (B,3,R,R) is free.
    return out_big[:B].reshape(B, 3, R, R)


# ---------------------------------------------------------------------------
# Public wrapper + pure-JAX reference
# ---------------------------------------------------------------------------
def secret2image(secret, weight, bias, resolution):
    """secret: (B, S); weight: (768, S); bias: (768,). Returns (B, 3, R, R) f32."""
    assert resolution % 16 == 0, "Resolution must be a multiple of 16."
    R = int(resolution)
    secret = secret.astype(jnp.float32)
    wt = weight.astype(jnp.float32).T                 # (S, 768)
    bias2d = bias.astype(jnp.float32).reshape(1, 768)
    if R < 128:
        return _secret2image_small(secret, wt, bias2d, R)
    return _secret2image_large(secret, wt, bias2d, R)


def reference(secret, weight, bias, resolution):
    """Pure-JAX reference matching the PyTorch module."""
    s = resolution // 16
    y = secret @ weight.T + bias                          # nn.Linear
    x = y.reshape(-1, 3, 16, 16)                          # .view
    up = jnp.repeat(jnp.repeat(x, s, axis=2), s, axis=3)  # nearest upsample
    return jnp.maximum(up, 0.0)                           # ReLU


if __name__ == "__main__":
    B = 2
    secret_len = 8
    resolution = 32  # multiple of 16; scale factor 2 -> small (folded) path

    key = jax.random.PRNGKey(0)
    k1, k2, k3 = jax.random.split(key, 3)

    # Deterministic synthetic parameters (PyTorch-Linear-like uniform init).
    bound = 1.0 / jnp.sqrt(secret_len)
    weight = jax.random.uniform(k1, (16 * 16 * 3, secret_len),
                                minval=-bound, maxval=bound, dtype=jnp.float32)
    bias = jax.random.uniform(k2, (16 * 16 * 3,),
                              minval=-bound, maxval=bound, dtype=jnp.float32)
    secret = jax.random.normal(k3, (B, secret_len), dtype=jnp.float32)

    out = jax.block_until_ready(secret2image(secret, weight, bias, resolution))
    ref = reference(secret, weight, bias, resolution)
    assert out.shape == (B, 3, resolution, resolution), out.shape
    assert jnp.allclose(out, ref, atol=1e-5, rtol=1e-5), float(jnp.max(jnp.abs(out - ref)))

    # Also exercise the large-R (H-tiled) path once, still at a small shape.
    R2 = 128
    out2 = jax.block_until_ready(secret2image(secret, weight, bias, R2))
    ref2 = reference(secret, weight, bias, R2)
    assert out2.shape == (B, 3, R2, R2), out2.shape
    assert jnp.allclose(out2, ref2, atol=1e-5, rtol=1e-5), float(jnp.max(jnp.abs(out2 - ref2)))

    print("KERNEL_OK")
</pallas_src>

<mosaic_0001>
module attributes {stable_mosaic.version = 11 : i64} {
  func.func @fused_fold_kernel(%arg0: i32, %arg1: memref<8x8xf32, #tpu.memory_space<vmem>>, %arg2: memref<8x3072xf32, #tpu.memory_space<vmem>>, %arg3: memref<1x3072xf32, #tpu.memory_space<vmem>>, %arg4: memref<8x3072xf32, #tpu.memory_space<vmem>>) attributes {dimension_semantics = [#tpu.dimension_semantics<parallel>], iteration_bounds = array<i64: 1>, scalar_prefetch = 0 : i64, scratch_operands = 0 : i64, tpu.core_type = #tpu.core_type<tc>, window_params = [{transform_indices = @transform_0, window_bounds = array<i64: 8, 8>}, {pipeline_mode = #tpu.pipeline_mode<synchronous>, transform_indices = @transform_1, window_bounds = array<i64: 8, 3072>}, {pipeline_mode = #tpu.pipeline_mode<synchronous>, transform_indices = @transform_2, window_bounds = array<i64: 1, 3072>}, {transform_indices = @transform_3, window_bounds = array<i64: 8, 3072>}]} {
    %c0 = arith.constant 0 : index
    %c0_0 = arith.constant 0 : index
    %0 = vector.load %arg1[%c0, %c0_0] : memref<8x8xf32, #tpu.memory_space<vmem>>, vector<8x8xf32>
    %c0_1 = arith.constant 0 : index
    %c0_2 = arith.constant 0 : index
    %1 = vector.load %arg2[%c0_1, %c0_2] : memref<8x3072xf32, #tpu.memory_space<vmem>>, vector<8x3072xf32>
    %cst = arith.constant dense<0.000000e+00> : vector<8x3072xf32>
    %2 = tpu.matmul %0, %1, %cst {dimension_numbers = #tpu.dot_dimension_numbers<[1], [0], [0], [1], [0, 0, 1, 1], [], []>} : vector<8x8xf32>, vector<8x3072xf32>, vector<8x3072xf32> -> vector<8x3072xf32>
    %c0_3 = arith.constant 0 : index
    %c0_4 = arith.constant 0 : index
    %3 = vector.load %arg3[%c0_3, %c0_4] : memref<1x3072xf32, #tpu.memory_space<vmem>>, vector<1x3072xf32>
    %4 = vector.broadcast %3 : vector<1x3072xf32> to vector<8x3072xf32>
    %5 = arith.addf %2, %4 : vector<8x3072xf32>
    %cst_5 = arith.constant 0.000000e+00 : f32
    %6 = vector.broadcast %cst_5 : f32 to vector<8x3072xf32>
    %7 = arith.maximumf %5, %6 : vector<8x3072xf32>
    %c0_6 = arith.constant 0 : index
    %c0_7 = arith.constant 0 : index
    %8 = vector.load %arg4[%c0_6, %c0_7] : memref<8x3072xf32, #tpu.memory_space<vmem>>, vector<8x3072xf32>
    tpu.vector_store %arg4[%c0_6, %c0_7], %7 {strides = array<i32>} : memref<8x3072xf32, #tpu.memory_space<vmem>>, vector<8x3072xf32>,
    return
  }
  func.func @transform_0(%arg0: i32) -> (i32, i32) {
    %c0_i32 = arith.constant 0 : i32
    %c0_i32_0 = arith.constant 0 : i32
    return %arg0, %c0_i32 : i32, i32
  }
  func.func @transform_1(%arg0: i32) -> (i32, i32) {
    %c0_i32 = arith.constant 0 : i32
    %c0_i32_0 = arith.constant 0 : i32
    %c0_i32_1 = arith.constant 0 : i32
    return %c0_i32, %c0_i32_0 : i32, i32
  }
  func.func @transform_2(%arg0: i32) -> (i32, i32) {
    %c0_i32 = arith.constant 0 : i32
    %c0_i32_0 = arith.constant 0 : i32
    %c0_i32_1 = arith.constant 0 : i32
    return %c0_i32, %c0_i32_0 : i32, i32
  }
  func.func @transform_3(%arg0: i32) -> (i32, i32) {
    %c0_i32 = arith.constant 0 : i32
    %c0_i32_0 = arith.constant 0 : i32
    return %arg0, %c0_i32 : i32, i32
  }
}

</mosaic_0001>

<bundles_post_ra>
// kernel: tpu_custom_call.1
= control target key start
LH: loop header
LB: loop body
LE: loop exit
PB: predicated region body
PF: predicated region fallthrough
CT: control target
= control target key end

     0   :  { %8 = vsyncpa [#allocation3], 0  ;;  %s1359_s0 = inlined_call_operand.hbm [shape: f32[8,8], index: 0, kind: input, shape index: {}]   ;;  %s1360_s1 = inlined_call_operand.hbm [shape: f32[8,3072], index: 1, kind: input, shape index: {}]   ;;  %s1361_s2 = inlined_call_operand.hbm [shape: f32[1,3072], index: 2, kind: input, shape index: {}]   ;;  %s1362_s3 = inlined_call_operand.hbm [shape: f32[8,3072], index: 3, kind: output, shape index: {}]  }
   0x1   :  { %9 = vsyncpa [#allocation6], 0 }
   0x2   :  { %10 = vsyncpa [#allocation4], 0  ;;  %s1224_s12 = smov [#allocation5]   ;;  %s1225_s14 = smov [#allocation2]  }
   0x3   :  { %s27_s13 = sshll.u32 %s1224_s12, 4  ;;  %s17_s15 = sshll.u32 %s1225_s14, 4  ;;  %s28_s13 = int_to_ptr.vmem [resolvable:$true] %s27_s13  ;;  %s18_s15 = int_to_ptr.vmem [resolvable:$true] %s17_s15 }
   0x4   :  { %s1146_s16 = scalar_lea.vmem %s28_s13, 3072  ;;  %p1151_p1 = scmp.lt.s32.totalorder %s28_s13, %s28_s13 }
   0x5   :  { %p1147_p0 = scmp.ne.s32.totalorder %s28_s13, %s1146_s16  ;;  %p1152_p2 = scmp.lt.s32.totalorder %s1146_s16, %s1146_s16 }
   0x7   :  { %p1153_p3 = por %p1152_p2, %p1151_p1 }
   0x9   :  { %p1154_p4 = pnand %p1153_p3, %p1147_p0 }
   0xb   :  { %1157 = shalt.err (!%p1154_p4)
}
   0xc   :  { %30 = dma.hbm_to_vmem [thread:$0]  %s1360_s1, 3072, %s28_s13, [#allocation6]  }
   0xd   :  { %s1166_s19 = scalar_lea.vmem %s18_s15, 128  ;;  %p1171_p6 = scmp.lt.s32.totalorder %s18_s15, %s18_s15 }
   0xe   :  { %p1167_p5 = scmp.ne.s32.totalorder %s18_s15, %s1166_s19  ;;  %p1172_p7 = scmp.lt.s32.totalorder %s1166_s19, %s1166_s19 }
  0x10   :  { %p1173_p8 = por %p1172_p7, %p1171_p6 }
  0x12   :  { %p1174_p9 = pnand %p1173_p8, %p1167_p5 }
  0x14   :  { %1177 = shalt.err (!%p1174_p9)
}
  0x15   :  { %20 = dma.hbm_to_vmem [thread:$0]  %s1359_s0, 128, %s18_s15, [#allocation3]  }
  0x16   :  { %s1226_s22 = smov [#allocation7]  }
  0x17   :  { %s37_s23 = sshll.u32 %s1226_s22, 4  ;;  %s38_s23 = int_to_ptr.vmem [resolvable:$true] %s37_s23 }
  0x18   :  { %s1186_s24 = scalar_lea.vmem %s38_s23, 384  ;;  %p1191_p11 = scmp.lt.s32.totalorder %s38_s23, %s38_s23 }
  0x19   :  { %p1187_p10 = scmp.ne.s32.totalorder %s38_s23, %s1186_s24  ;;  %p1192_p12 = scmp.lt.s32.totalorder %s1186_s24, %s1186_s24 }
  0x1b   :  { %p1193_p13 = por %p1192_p12, %p1191_p11 }
  0x1d   :  { %p1194_p0 = pnand %p1193_p13, %p1187_p10 }
  0x1f   :  { %1197 = shalt.err (!%p1194_p0)
}
  0x20   :  { %40 = dma.hbm_to_vmem [thread:$0]  %s1361_s2, 384, %s38_s23, [#allocation6]  }
  0x21   :  { %1218 = dma.done.wait [#allocation3], 128  }
  0x22   :  { %1219 = vsyncadd [#allocation3], 4294967168 }
  0x23   :  { %1220 = dma.done.wait [#allocation6], 3456  }
  0x24   :  { %1221 = vsyncadd [#allocation6], 4294963840  ;;  %v1227_v0 = vmov 0.0   ;;  %v52_v1 = vld [vmem:[#allocation5 + $0x8] sm:$0xff]  ;;  %v54_v2 = vld [vmem:[#allocation5 + $0x18] sm:$0xff]  ;;  %vm201_vm0 = vcmask 64512   ;;  %v81_v26 = vlaneseq }
  0x25   :  { %269 = vmatprep.mubr.f32.mxu0 %v1227_v0  ;;  %340 = vmatprep.mubr.f32.mxu1 %v1227_v0  ;;  %v51_v3 = vld [vmem:[#allocation5] sm:$0xff]  ;;  %v53_v4 = vld [vmem:[#allocation5 + $0x10] sm:$0xff]  ;;  %v1260_v5 = vld [vmem:[#allocation2] sm:$0xff]  ;;  %s1228_s0 = smov [#allocation8]  }
  0x26   :  { %235 = vmatprep.subr.mxu0 %v52_v1  ;;  %306 = vmatprep.subr.mxu1 %v54_v2  ;;  %v56_v6 = vld [vmem:[#allocation5 + $0x28] sm:$0xff]  ;;  %v58_v7 = vld [vmem:[#allocation5 + $0x38] sm:$0xff]  ;;  %v55_v8 = vld [vmem:[#allocation5 + $0x20] sm:$0xff]  ;;  %v82_v27 = vshrl.u32 %v81_v26, 7  ;;  %s1111_s2 = sshll.u32 %s1228_s0, 4  ;;  %s1112_s2 = int_to_ptr.vmem [resolvable:$true] %s1111_s2 }
  0x27   :  { %236 = vmatpush1.msra.mxu0 %v51_v3  ;;  %307 = vmatpush1.msra.mxu1 %v53_v4  ;;  %v57_v9 = vld [vmem:[#allocation5 + $0x30] sm:$0xff]  ;;  %v60_v10 = vld [vmem:[#allocation5 + $0x48] sm:$0xff]  ;;  %v62_v11 = vld [vmem:[#allocation5 + $0x58] sm:$0xff]  ;;  %s1198_s26 = scalar_lea.vmem %s1112_s2, 3072  ;;  %p1203_p2 = scmp.lt.s32.totalorder %s1112_s2, %s1112_s2 }
  0x28   :  { %1121 = vmatmul.mubr.msk.f32.vlgmr.msra.gmra.mxu0 %vm201_vm0, %v1260_v5  ;;  %1122 = vmatmul.mubr.msk.f32.vlgmr.msra.gmra.mxu1 %vm201_vm0, %v1260_v5  ;;  %v59_v12 = vld [vmem:[#allocation5 + $0x40] sm:$0xff]  ;;  %v61_v13 = vld [vmem:[#allocation5 + $0x50] sm:$0xff]  ;;  %v64_v14 = vld [vmem:[#allocation5 + $0x68] sm:$0xff]  ;;  %v1296_v28 = vsub.s32 0, %v82_v27  ;;  %v1298_v29 = vsub.s32 2, %v82_v27  ;;  %v1300_v31 = vsub.s32 1, %v82_v27  ;;  %p1199_p1 = scmp.ne.s32.totalorder %s1112_s2, %s1198_s26  ;;  %p1204_p3 = scmp.lt.s32.totalorder %s1198_s26, %s1198_s26 }
  0x29   :  { %377 = vmatprep.subr.mxu0 %v56_v6  ;;  %448 = vmatprep.subr.mxu1 %v58_v7  ;;  %v66_v15 = vld [vmem:[#allocation5 + $0x78] sm:$0xff]  ;;  %v63_v16 = vld [vmem:[#allocation5 + $0x60] sm:$0xff]  ;;  %v65_v17 = vld [vmem:[#allocation5 + $0x70] sm:$0xff]  ;;  %v1302_v32 = vsub.s32 3, %v82_v27  ;;  %v1306_v35 = vsub.s32 4, %v82_v27  ;;  %v1308_v36 = vsub.s32 6, %v82_v27 }
  0x2a   :  { %378 = vmatpush1.msra.mxu0 %v55_v8  ;;  %449 = vmatpush1.msra.mxu1 %v57_v9  ;;  %v68_v18 = vld [vmem:[#allocation5 + $0x88] sm:$0xff]  ;;  %v70_v19 = vld [vmem:[#allocation5 + $0x98] sm:$0xff]  ;;  %v67_v20 = vld [vmem:[#allocation5 + $0x80] sm:$0xff]  ;;  %v1310_v37 = vsub.s32 5, %v82_v27  ;;  %v1312_v38 = vsub.s32 7, %v82_v27  ;;  %p1205_p4 = por %p1204_p3, %p1203_p2 }
  0x2b   :  { %411 = vmatprep.mubr.f32.mxu0 %v1227_v0  ;;  %482 = vmatprep.mubr.f32.mxu1 %v1227_v0  ;;  %v69_v21 = vld [vmem:[#allocation5 + $0x90] sm:$0xff]  ;;  %v72_v22 = vld [vmem:[#allocation5 + $0xa8] sm:$0xff]  ;;  %v74_v23 = vld [vmem:[#allocation5 + $0xb8] sm:$0xff] }
  0x2c   :  { %1123 = vmatmul.mubr.msk.f32.vlgmr.msra.gmra.mxu0 %vm201_vm0, %v1260_v5  ;;  %1124 = vmatmul.mubr.msk.f32.vlgmr.msra.gmra.mxu1 %vm201_vm0, %v1260_v5  ;;  %v71_v24 = vld [vmem:[#allocation5 + $0xa0] sm:$0xff]  ;;  %v73_v25 = vld [vmem:[#allocation5 + $0xb0] sm:$0xff]  ;;  %v1318_v47 = vld [vmem:[#allocation7 + $0x8] sm:$0xff]  ;;  %p1206_p5 = pnand %p1205_p4, %p1199_p1 }
  0x2d   :  { %519 = vmatprep.subr.mxu0 %v60_v10  ;;  %590 = vmatprep.subr.mxu1 %v62_v11  ;;  %v75_v30 = vld [vmem:[#allocation7] sm:$0xff]  ;;  %v116_v58 = vrot.slane %v1318_v47, %v1296_v28  ;;  %v124_v59 = vrot.slane %v1318_v47, %v1298_v29  ;;  %v120_v2 = vrot.slane %v1318_v47, %v1300_v31 }
  0x2e   :  { %520 = vmatpush1.msra.mxu0 %v59_v12  ;;  %591 = vmatpush1.msra.mxu1 %v61_v13  ;;  %v84_v33 = vrot.slane %v75_v30, %v1296_v28  ;;  %v92_v34 = vrot.slane %v75_v30, %v1298_v29  ;;  %v88_v39 = vrot.slane %v75_v30, %v1300_v31 }
  0x2f   :  { %553 = vmatprep.mubr.f32.mxu0 %v1227_v0  ;;  %624 = vmatprep.mubr.f32.mxu1 %v1227_v0  ;;  %v96_v40 = vrot.slane %v75_v30, %v1302_v32  ;;  %v100_v45 = vrot.slane %v75_v30, %v1306_v35  ;;  %v108_v46 = vrot.slane %v75_v30, %v1308_v36 }
  0x30   :  { %1125 = vmatmul.mubr.msk.f32.vlgmr.msra.gmra.mxu0 %vm201_vm0, %v1260_v5  ;;  %1126 = vmatmul.mubr.msk.f32.vlgmr.msra.gmra.mxu1 %vm201_vm0, %v1260_v5  ;;  %v104_v50 = vrot.slane %v75_v30, %v1310_v37  ;;  %v112_v51 = vrot.slane %v75_v30, %v1312_v38  ;;  %v128_v3 = vrot.slane %v1318_v47, %v1302_v32 }
  0x31   :  { %661 = vmatprep.subr.mxu0 %v64_v14  ;;  %732 = vmatprep.subr.mxu1 %v66_v15  ;;  %v132_v10 = vrot.slane %v1318_v47, %v1306_v35  ;;  %v140_v11 = vrot.slane %v1318_v47, %v1308_v36 }
  0x32   :  { %662 = vmatpush1.msra.mxu0 %v63_v16  ;;  %733 = vmatpush1.msra.mxu1 %v65_v17  ;;  %v1334_v16 = vld [vmem:[#allocation7 + $0x10] sm:$0xff] }
  0x33   :  { %695 = vmatprep.mubr.f32.mxu0 %v1227_v0  ;;  %766 = vmatprep.mubr.f32.mxu1 %v1227_v0  ;;  %v148_v27 = vrot.slane %v1334_v16, %v1296_v28  ;;  %v156_v30 = vrot.slane %v1334_v16, %v1298_v29 }
  0x34   :  { %1127 = vmatmul.mubr.msk.f32.vlgmr.msra.gmra.mxu0 %vm201_vm0, %v1260_v5  ;;  %1128 = vmatmul.mubr.msk.f32.vlgmr.msra.gmra.mxu1 %vm201_vm0, %v1260_v5 }
  0x35   :  { %803 = vmatprep.subr.mxu0 %v68_v18  ;;  %874 = vmatprep.subr.mxu1 %v70_v19  ;;  %v136_v19 = vrot.slane %v1318_v47, %v1310_v37 }
  0x36   :  { %804 = vmatpush1.msra.mxu0 %v67_v20  ;;  %875 = vmatpush1.msra.mxu1 %v69_v21  ;;  %v144_v20 = vrot.slane %v1318_v47, %v1312_v38 }
  0x37   :  { %837 = vmatprep.mubr.f32.mxu0 %v1227_v0  ;;  %908 = vmatprep.mubr.f32.mxu1 %v1227_v0 }
  0x38   :  { %1129 = vmatmul.mubr.msk.f32.vlgmr.msra.gmra.mxu0 %vm201_vm0, %v1260_v5  ;;  %1130 = vmatmul.mubr.msk.f32.vlgmr.msra.gmra.mxu1 %vm201_vm0, %v1260_v5 }
  0x39   :  { %945 = vmatprep.subr.mxu0 %v72_v22  ;;  %1016 = vmatprep.subr.mxu1 %v74_v23 }
  0x3a   :  { %946 = vmatpush1.msra.mxu0 %v71_v24  ;;  %1017 = vmatpush1.msra.mxu1 %v73_v25 }
  0x3b   :  { %979 = vmatprep.mubr.f32.mxu0 %v1227_v0  ;;  %1050 = vmatprep.mubr.f32.mxu1 %v1227_v0 }
  0x3c   :  { %1131 = vmatmul.mubr.msk.f32.vlgmr.msra.gmra.mxu0 %vm201_vm0, %v1260_v5  ;;  %1132 = vmatmul.mubr.msk.f32.vlgmr.msra.gmra.mxu1 %vm201_vm0, %v1260_v5 }
  0xe8   :  { %v271_v41 = vpop.f32.mrf.mxu0  ;;  %v342_v42 = vpop.f32.mrf.mxu1 }
  0xe9   :  { %v272_v43 = vadd.f32 %v271_v41, %v84_v33  ;;  %v343_v44 = vadd.f32 %v342_v42, %v92_v34 }
  0xea   :  { %v273_v48 = vpop.f32.mrf.mxu0  ;;  %v344_v49 = vpop.f32.mrf.mxu1 }
  0xeb   :  { %v1057_v52 = vmax.f32 %v272_v43, 0.0  ;;  %v1059_v53 = vmax.f32 %v343_v44, 0.0  ;;  %v274_v54 = vadd.f32 %v273_v48, %v88_v39  ;;  %v345_v55 = vadd.f32 %v344_v49, %v96_v40 }
  0xec   :  { %v413_v56 = vpop.f32.mrf.mxu0  ;;  %v484_v57 = vpop.f32.mrf.mxu1  ;;  %v152_v43 = vrot.slane %v1334_v16, %v1300_v31  ;;  %v160_v44 = vrot.slane %v1334_v16, %v1302_v32  ;;  %v164_v49 = vrot.slane %v1334_v16, %v1306_v35 }
  0xed   :  { %1081 = vst [vmem:[#allocation8] sm:$0xff] %v1057_v52  ;;  %1083 = vst [vmem:[#allocation8 + $0x10] sm:$0xff] %v1059_v53  ;;  %v1058_v60 = vmax.f32 %v274_v54, 0.0  ;;  %v1060_v61 = vmax.f32 %v345_v55, 0.0  ;;  %v414_v62 = vadd.f32 %v413_v56, %v100_v45  ;;  %v485_v63 = vadd.f32 %v484_v57, %v108_v46 }
  0xee   :  { %v415_v0 = vpop.f32.mrf.mxu0  ;;  %v486_v1 = vpop.f32.mrf.mxu1  ;;  %v168_v55 = vrot.slane %v1334_v16, %v1310_v37  ;;  %v176_v56 = vrot.slane %v1334_v16, %v1312_v38 }
  0xef   :  { %1082 = vst [vmem:[#allocation8 + $0x8] sm:$0xff] %v1058_v60  ;;  %1084 = vst [vmem:[#allocation8 + $0x18] sm:$0xff] %v1060_v61  ;;  %v1061_v4 = vmax.f32 %v414_v62, 0.0  ;;  %v1063_v5 = vmax.f32 %v485_v63, 0.0  ;;  %v416_v6 = vadd.f32 %v415_v0, %v104_v50  ;;  %v487_v7 = vadd.f32 %v486_v1, %v112_v51 }
  0xf0   :  { %v555_v8 = vpop.f32.mrf.mxu0  ;;  %v626_v9 = vpop.f32.mrf.mxu1  ;;  %v172_v50 = vrot.slane %v1334_v16, %v1308_v36 }
  0xf1   :  { %1085 = vst [vmem:[#allocation8 + $0x20] sm:$0xff] %v1061_v4  ;;  %1087 = vst [vmem:[#allocation8 + $0x30] sm:$0xff] %v1063_v5  ;;  %v1062_v12 = vmax.f32 %v416_v6, 0.0  ;;  %v1064_v13 = vmax.f32 %v487_v7, 0.0  ;;  %v556_v14 = vadd.f32 %v555_v8, %v116_v58  ;;  %v627_v15 = vadd.f32 %v626_v9, %v124_v59 }
  0xf2   :  { %v557_v17 = vpop.f32.mrf.mxu0  ;;  %v628_v18 = vpop.f32.mrf.mxu1 }
  0xf3   :  { %1086 = vst [vmem:[#allocation8 + $0x28] sm:$0xff] %v1062_v12  ;;  %1088 = vst [vmem:[#allocation8 + $0x38] sm:$0xff] %v1064_v13  ;;  %v1065_v21 = vmax.f32 %v556_v14, 0.0  ;;  %v1067_v22 = vmax.f32 %v627_v15, 0.0  ;;  %v558_v23 = vadd.f32 %v557_v17, %v120_v2  ;;  %v629_v24 = vadd.f32 %v628_v18, %v128_v3 }
  0xf4   :  { %v697_v25 = vpop.f32.mrf.mxu0  ;;  %v768_v26 = vpop.f32.mrf.mxu1 }
  0xf5   :  { %1089 = vst [vmem:[#allocation8 + $0x40] sm:$0xff] %v1065_v21  ;;  %1091 = vst [vmem:[#allocation8 + $0x50] sm:$0xff] %v1067_v22  ;;  %v1066_v33 = vmax.f32 %v558_v23, 0.0  ;;  %v1068_v34 = vmax.f32 %v629_v24, 0.0  ;;  %v698_v39 = vadd.f32 %v697_v25, %v132_v10  ;;  %v769_v40 = vadd.f32 %v768_v26, %v140_v11 }
  0xf6   :  { %v699_v41 = vpop.f32.mrf.mxu0  ;;  %v770_v42 = vpop.f32.mrf.mxu1 }
  0xf7   :  { %1090 = vst [vmem:[#allocation8 + $0x48] sm:$0xff] %v1066_v33  ;;  %1092 = vst [vmem:[#allocation8 + $0x58] sm:$0xff] %v1068_v34  ;;  %v1069_v28 = vmax.f32 %v698_v39, 0.0  ;;  %v1071_v45 = vmax.f32 %v769_v40, 0.0  ;;  %v700_v46 = vadd.f32 %v699_v41, %v136_v19  ;;  %v771_v29 = vadd.f32 %v770_v42, %v144_v20 }
  0xf8   :  { %v839_v47 = vpop.f32.mrf.mxu0  ;;  %v910_v48 = vpop.f32.mrf.mxu1 }
  0xf9   :  { %1093 = vst [vmem:[#allocation8 + $0x60] sm:$0xff] %v1069_v28  ;;  %1095 = vst [vmem:[#allocation8 + $0x70] sm:$0xff] %v1071_v45  ;;  %v1070_v31 = vmax.f32 %v700_v46, 0.0  ;;  %v1072_v51 = vmax.f32 %v771_v29, 0.0  ;;  %v840_v52 = vadd.f32 %v839_v47, %v148_v27  ;;  %v911_v32 = vadd.f32 %v910_v48, %v156_v30 }
  0xfa   :  { %v841_v53 = vpop.f32.mrf.mxu0  ;;  %v912_v54 = vpop.f32.mrf.mxu1 }
  0xfb   :  { %1094 = vst [vmem:[#allocation8 + $0x68] sm:$0xff] %v1070_v31  ;;  %1096 = vst [vmem:[#allocation8 + $0x78] sm:$0xff] %v1072_v51  ;;  %v1073_v35 = vmax.f32 %v840_v52, 0.0  ;;  %v1075_v57 = vmax.f32 %v911_v32, 0.0  ;;  %v842_v58 = vadd.f32 %v841_v53, %v152_v43  ;;  %v913_v36 = vadd.f32 %v912_v54, %v160_v44 }
  0xfc   :  { %v981_v59 = vpop.f32.mrf.mxu0  ;;  %v1052_v60 = vpop.f32.mrf.mxu1 }
  0xfd   :  { %1097 = vst [vmem:[#allocation8 + $0x80] sm:$0xff] %v1073_v35  ;;  %1099 = vst [vmem:[#allocation8 + $0x90] sm:$0xff] %v1075_v57  ;;  %v1074_v61 = vmax.f32 %v842_v58, 0.0  ;;  %v1076_v62 = vmax.f32 %v913_v36, 0.0  ;;  %v982_v63 = vadd.f32 %v981_v59, %v164_v49  ;;  %v1053_v0 = vadd.f32 %v1052_v60, %v172_v50 }
  0xfe   :  { %v983_v1 = vpop.f32.mrf.mxu0  ;;  %v1054_v2 = vpop.f32.mrf.mxu1 }
  0xff   :  { %1098 = vst [vmem:[#allocation8 + $0x88] sm:$0xff] %v1074_v61  ;;  %1100 = vst [vmem:[#allocation8 + $0x98] sm:$0xff] %v1076_v62  ;;  %v1077_v37 = vmax.f32 %v982_v63, 0.0  ;;  %v1079_v38 = vmax.f32 %v1053_v0, 0.0  ;;  %v984_v3 = vadd.f32 %v983_v1, %v168_v55  ;;  %v1055_v4 = vadd.f32 %v1054_v2, %v176_v56 }
 0x101   :  { %1101 = vst [vmem:[#allocation8 + $0xa0] sm:$0xff] %v1077_v37  ;;  %1103 = vst [vmem:[#allocation8 + $0xb0] sm:$0xff] %v1079_v38  ;;  %v1078_v5 = vmax.f32 %v984_v3, 0.0  ;;  %v1080_v6 = vmax.f32 %v1055_v4, 0.0 }
 0x103   :  { %1102 = vst [vmem:[#allocation8 + $0xa8] sm:$0xff] %v1078_v5  ;;  %1104 = vst [vmem:[#allocation8 + $0xb8] sm:$0xff] %v1080_v6 }
 0x104   :  { %1209 = shalt.err (!%p1206_p5)
}
 0x105   :  { %1114 = dma.vmem_to_hbm [thread:$0]  %s1112_s2, 3072, %s1362_s3, [#allocation4]  }
 0x106   :  { %1222 = dma.done.wait [#allocation4], 3072  }
 0x107   :  { %1223 = vsyncadd [#allocation4], 4294964224 }
 0x108   :  { %1118 = vsyncpa [#allocation3], 1 }
 0x109   :  { %1119 = vsyncpa [#allocation6], 1 }
 0x10a   :  { %1120 = vsyncpa [#allocation4], 1 }

</bundles_post_ra>
